<compile_context>
chip_gen: v7x
topology: tpu7x:2x2x1
jax: 0.10.0
libtpu: 0.0.40
codegen_flags: <defaults>
</compile_context>

<pallas_src>
import jax
import jax.numpy as jnp
from jax.experimental import pallas as pl
from jax.experimental.pallas import tpu as pltpu


_LANES = 128
_NEG_BIG = -1e30                       # finite pad-column bias -> no inf-inf NaNs
_MAX_FUSED_VMEM = 20 * 1024 * 1024     # budget gate for the single-kernel fused path


def _round_up(x, m):
    return ((x + m - 1) // m) * m


# ----------------------------- tile selection -------------------------------

def _choose_k(D):
    # Keep the whole reduction in one block whenever it fits (nk == 1) so x is
    # fetched once and stays resident across the vocab sweep.
    if D <= 2048:
        return D, D
    tk = 2048
    return tk, _round_up(D, tk)


def _choose_v(V):
    Vp = _round_up(V, _LANES)          # lane-dense vocab tiles
    if Vp <= 512:
        return Vp, Vp
    return 512, _round_up(V, 512)


def _choose_m(M):
    # Large tm => W is streamed fewer times (arithmetic intensity ~ tm flop/byte).
    # For M <= 1024 read W exactly once (gm == 1); otherwise tm = 512 keeps intensity
    # near/above the v6e/v7x ridge and gives gm >= 2 for megacore sharding.
    if M <= 1024:
        tm = max(_round_up(M, 16), 16)  # bf16 minimum sublane tile is 16
        return tm, tm
    return 512, _round_up(M, 512)


def _compiler_params(dimension_semantics, est_bytes):
    # Size the scoped-VMEM request to estimated usage + headroom; never ask for the
    # full 64 MiB physical VMEM of v7x.
    vmem_limit = int(min(max(2 * est_bytes, 16 * 1024 * 1024), 48 * 1024 * 1024))
    return pltpu.CompilerParams(dimension_semantics=dimension_semantics,
                                vmem_limit_bytes=vmem_limit)


# ----------------------- lane-wise softmax statistics -----------------------
# Only 128-aligned static slices (vreg-column selection, no relayout): the group
# reductions run on the VALU/EUP and hide under the MXU; the single cross-lane
# (XLU) reduction per row is done once, in the epilogue.

def _lanewise_max(logits):
    n = logits.shape[-1]
    m = logits[:, :_LANES]
    for i in range(1, n // _LANES):
        m = jnp.maximum(m, logits[:, i * _LANES:(i + 1) * _LANES])
    return m                                            # (tm, 128)


def _lanewise_sumexp(logits, m):
    n = logits.shape[-1]
    s = jnp.zeros(logits.shape[:-1] + (_LANES,), jnp.float32)
    for i in range(n // _LANES):
        s = s + jnp.exp(logits[:, i * _LANES:(i + 1) * _LANES] - m)
    return s                                            # (tm, 128)


# --------------------- fused kernel (vocab fits one tile) -------------------

def _fused_generator_kernel(x_ref, w_ref, b_ref, out_ref):
    # logits = x @ W + b, computed and normalized entirely in VMEM (no HBM round trip).
    logits = (jnp.dot(x_ref[...], w_ref[...], preferred_element_type=jnp.float32)
              + b_ref[...])
    m_lane = _lanewise_max(logits)                       # VALU
    m_row = jnp.max(m_lane, axis=-1, keepdims=True)      # one XLU reduce per row
    # NOTE: exp kept in f32 (bf16-EUP exp would be faster on v6e/v7x but costs accuracy
    # and is unsupported on v5e).
    l_lane = _lanewise_sumexp(logits, m_row)             # EUP exp + VALU adds
    l_row = jnp.sum(l_lane, axis=-1, keepdims=True)      # one XLU reduce per row
    out_ref[...] = logits - (m_row + jnp.log(l_row))


# ------------- two-pass kernel 1: projection + running logsumexp ------------

def _make_proj_lse_kernel(with_acc):
    def kernel(x_ref, w_ref, b_ref, logits_ref, lse_ref, *scratch):
        if with_acc:
            acc_ref, m_ref, l_ref = scratch
        else:
            m_ref, l_ref = scratch

        j = pl.program_id(1)                 # vocab tile
        k = pl.program_id(2)                 # d_model (reduction) tile
        nj = pl.num_programs(1)
        nk = pl.num_programs(2)

        @pl.when((j == 0) & (k == 0))
        def _init_stats():
            m_ref[...] = jnp.full_like(m_ref, -jnp.inf)
            l_ref[...] = jnp.zeros_like(l_ref)

        prod = jnp.dot(x_ref[...], w_ref[...], preferred_element_type=jnp.float32)

        def _finish_tile(logits):
            # bf16 intermediate logits: 8 B/elem on the finalize path instead of 12.
            logits_ref[...] = logits.astype(logits_ref.dtype)
            m_old = m_ref[...]
            m_new = jnp.maximum(m_old, _lanewise_max(logits))
            l_ref[...] = (l_ref[...] * jnp.exp(m_old - m_new)
                          + _lanewise_sumexp(logits, m_new))
            m_ref[...] = m_new

        if not with_acc:                     # nk == 1: no accumulator RMW at all
            _finish_tile(prod + b_ref[...])
        else:
            @pl.when(k == 0)
            def _zero_acc():
                acc_ref[...] = jnp.zeros_like(acc_ref)

            acc_ref[...] += prod

            @pl.when(k == nk - 1)
            def _finish():
                _finish_tile(acc_ref[...] + b_ref[...])

        @pl.when((j == nj - 1) & (k == nk - 1))
        def _store_lse():
            m_lane = m_ref[...]
            l_lane = l_ref[...]
            m_row = jnp.max(m_lane, axis=-1, keepdims=True)            # XLU, once/row
            l_row = jnp.sum(l_lane * jnp.exp(m_lane - m_row),
                            axis=-1, keepdims=True)
            lse_ref[...] = jnp.broadcast_to(m_row + jnp.log(l_row), lse_ref.shape)

    return kernel


# ----------------- two-pass kernel 2: out = logits - logsumexp --------------

def _finalize_kernel(logits_ref, lse_ref, out_ref):
    lse = lse_ref[...]
    out_ref[...] = logits_ref[...].astype(jnp.float32) - lse[:, :1]


# --------------------------------- wrapper ----------------------------------

def prepare_generator_params(w, b):
    """Pad + cast the (static) projection weights ONCE so per-call work is x-only.

    w: [d_model, vocab]  (== PyTorch nn.Linear(d_model, vocab).weight.T)
    b: [vocab]
    """
    D, V = w.shape
    _, Kp = _choose_k(D)
    _, Vp = _choose_v(V)
    if (Kp, Vp) == (D, V):
        wp = w.astype(jnp.bfloat16)                       # no copy-pad when aligned
    else:
        wp = jnp.zeros((Kp, Vp), jnp.bfloat16).at[:D, :V].set(w.astype(jnp.bfloat16))
    if Vp == V:
        bp = b.astype(jnp.float32).reshape(1, V)
    else:
        # Padded vocab columns get a huge negative (finite) bias so they contribute
        # ~0 to the softmax normalization and are sliced off afterwards.
        bp = jnp.full((1, Vp), _NEG_BIG, jnp.float32).at[0, :V].set(
            b.astype(jnp.float32))
    return {"wp": wp, "bp": bp, "d_model": D, "vocab": V}


def generator_apply(params, x, *, max_fused_vmem_bytes=_MAX_FUSED_VMEM):
    """log_softmax(x @ W + b, axis=-1) with pre-prepared (padded/bf16) weights."""
    wp, bp = params["wp"], params["bp"]
    D, V = params["d_model"], params["vocab"]
    Kp, Vp = wp.shape
    tk, _ = _choose_k(D)
    tn, _ = _choose_v(V)

    lead = x.shape[:-1]
    x2 = x.reshape(-1, D)
    M = x2.shape[0]
    tm, Mp = _choose_m(M)

    # Only x is padded/cast per call (weights were prepared once).
    if (Mp, Kp) == (M, D):
        xp = x2.astype(jnp.bfloat16)
    else:
        xp = jnp.zeros((Mp, Kp), jnp.bfloat16).at[:M, :D].set(x2.astype(jnp.bfloat16))

    gm, gn, gk = Mp // tm, Vp // tn, Kp // tk

    # VMEM footprint estimate for the fully fused (single-kernel) path.
    est_fused = (2 * tm * Kp * 2        # x blocks (bf16, double-buffered)
                 + 2 * Kp * Vp * 2      # full weight block
                 + 2 * 8 * Vp * 4       # bias (sublane-padded)
                 + 2 * tm * Vp * 4      # resident f32 output blocks
                 + tm * Vp * 4)         # live f32 logits temporaries

    if gk == 1 and est_fused <= max_fused_vmem_bytes:
        # ---------------- fully fused: logits never leave VMEM ----------------
        cost = pl.CostEstimate(
            flops=2 * Mp * Vp * Kp,
            transcendentals=Mp * Vp,
            bytes_accessed=Mp * Kp * 2 + Kp * Vp * 2 + 8 * Vp * 4 + Mp * Vp * 4)
        out_p = pl.pallas_call(
            _fused_generator_kernel,
            out_shape=jax.ShapeDtypeStruct((Mp, Vp), jnp.float32),
            grid=(gm,),
            in_specs=[pl.BlockSpec((tm, Kp), lambda i: (i, 0)),
                      pl.BlockSpec((Kp, Vp), lambda i: (0, 0)),
                      pl.BlockSpec((1, Vp), lambda i: (0, 0))],
            out_specs=pl.BlockSpec((tm, Vp), lambda i: (i, 0)),
            compiler_params=_compiler_params(("parallel",), est_fused),
            cost_estimate=cost,
        )(xp, wp, bp)
    else:
        # -------- two-pass: bf16 logits intermediate + f32 logsumexp --------
        with_acc = gk > 1
        scratch = [pltpu.VMEM((tm, _LANES), jnp.float32),   # running per-lane max
                   pltpu.VMEM((tm, _LANES), jnp.float32)]   # running per-lane sum-exp
        if with_acc:
            scratch = [pltpu.VMEM((tm, tn), jnp.float32)] + scratch

        est1 = (2 * tm * tk * 2 + 2 * tk * tn * 2 + 2 * 8 * tn * 4
                + 2 * tm * tn * 2 + 2 * tm * _LANES * 4 + 2 * tm * _LANES * 4
                + (tm * tn * 4 if with_acc else 0) + tm * tn * 4)
        cost1 = pl.CostEstimate(
            flops=2 * Mp * Vp * Kp,
            transcendentals=Mp * Vp,
            bytes_accessed=(Mp * Kp * 2 * (gn if gk > 1 else 1)
                            + gm * Kp * Vp * 2 + gm * 8 * Vp * 4
                            + Mp * Vp * 2 + Mp * _LANES * 4))

        logits16, lse = pl.pallas_call(
            _make_proj_lse_kernel(with_acc),
            out_shape=(jax.ShapeDtypeStruct((Mp, Vp), jnp.bfloat16),
                       jax.ShapeDtypeStruct((Mp, _LANES), jnp.float32)),
            grid=(gm, gn, gk),
            in_specs=[pl.BlockSpec((tm, tk), lambda i, j, k: (i, k)),
                      pl.BlockSpec((tk, tn), lambda i, j, k: (k, j)),
                      pl.BlockSpec((1, tn), lambda i, j, k: (0, j))],
            out_specs=(pl.BlockSpec((tm, tn), lambda i, j, k: (i, j)),
                       pl.BlockSpec((tm, _LANES), lambda i, j, k: (i, 0))),
            scratch_shapes=scratch,
            compiler_params=_compiler_params(
                ("parallel", "arbitrary", "arbitrary"), est1),
            cost_estimate=cost1,
        )(xp, wp, bp)

        # Finalize with large lane-dense blocks (purely HBM-bound).
        # (input_output_aliases is not applicable: bf16 input vs f32 output.)
        tn2 = Vp
        for c in (4096, 2048, 1024, 512, 256, 128):
            if Vp % c == 0:
                tn2 = min(c, Vp)
                break
        est2 = 2 * tm * tn2 * 2 + 2 * tm * tn2 * 4 + 2 * tm * _LANES * 4
        cost2 = pl.CostEstimate(flops=Mp * Vp, transcendentals=0,
                                bytes_accessed=Mp * Vp * 6 + Mp * _LANES * 4)
        out_p = pl.pallas_call(
            _finalize_kernel,
            out_shape=jax.ShapeDtypeStruct((Mp, Vp), jnp.float32),
            grid=(gm, Vp // tn2),
            in_specs=[pl.BlockSpec((tm, tn2), lambda i, j: (i, j)),
                      pl.BlockSpec((tm, _LANES), lambda i, j: (i, 0))],
            out_specs=pl.BlockSpec((tm, tn2), lambda i, j: (i, j)),
            compiler_params=_compiler_params(("parallel", "parallel"), est2),
            cost_estimate=cost2,
        )(logits16, lse)

    return out_p[:M, :V].reshape(*lead, V)


def generator_forward(x, w, b):
    """Convenience wrapper: prepares weights and applies in one call.
    For repeated calls, use prepare_generator_params once + generator_apply."""
    return generator_apply(prepare_generator_params(w, b), x)


# ----------------------------------- test -----------------------------------

if __name__ == "__main__":
    B, S, D, VOCAB = 2, 8, 32, 1000
    key = jax.random.PRNGKey(0)
    kx, kw, kb = jax.random.split(key, 3)

    x = jax.random.normal(kx, (B, S, D), jnp.float32)
    # [in, out] storage == PyTorch nn.Linear(d_model, vocab).weight.T
    w = jax.random.normal(kw, (D, VOCAB), jnp.float32) * 0.05
    b = jax.random.normal(kb, (VOCAB,), jnp.float32) * 0.05

    # Pure-JAX f32 reference (kernel uses bf16 operands with f32 accumulation).
    ref = jax.nn.log_softmax(jnp.einsum("bsd,dv->bsv", x, w) + b, axis=-1)

    def check(out):
        assert out.shape == (B, S, VOCAB)
        assert bool(jnp.all(jnp.isfinite(out)))
        assert bool(jnp.allclose(out, ref, atol=2e-2, rtol=2e-2))
        # rows must be proper log-probabilities
        assert bool(jnp.allclose(jnp.sum(jnp.exp(out), axis=-1), 1.0, atol=1e-3))

    # Fully fused single-kernel path (small vocab fits VMEM).
    out = jax.block_until_ready(generator_forward(x, w, b))
    check(out)

    # Two-pass fallback path (bf16 logits intermediate), forced for coverage;
    # weights are prepared once and reused.
    params = prepare_generator_params(w, b)
    out2 = jax.block_until_ready(
        generator_apply(params, x, max_fused_vmem_bytes=0))
    check(out2)

    print("KERNEL_OK")
</pallas_src>

<mosaic_0001>
module attributes {stable_mosaic.version = 11 : i64} {
  func.func @_fused_generator_kernel(%arg0: i32, %arg1: memref<16x32xbf16, #tpu.memory_space<vmem>>, %arg2: memref<32x1024xbf16, #tpu.memory_space<vmem>>, %arg3: memref<1x1024xf32, #tpu.memory_space<vmem>>, %arg4: memref<16x1024xf32, #tpu.memory_space<vmem>>) attributes {dimension_semantics = [#tpu.dimension_semantics<parallel>], iteration_bounds = array<i64: 1>, scalar_prefetch = 0 : i64, scratch_operands = 0 : i64, tpu.core_type = #tpu.core_type<tc>, window_params = [{transform_indices = @transform_0, window_bounds = array<i64: 16, 32>}, {pipeline_mode = #tpu.pipeline_mode<synchronous>, transform_indices = @transform_1, window_bounds = array<i64: 32, 1024>}, {pipeline_mode = #tpu.pipeline_mode<synchronous>, transform_indices = @transform_2, window_bounds = array<i64: 1, 1024>}, {transform_indices = @transform_3, window_bounds = array<i64: 16, 1024>}]} {
    %c0 = arith.constant 0 : index
    %c0_0 = arith.constant 0 : index
    %0 = vector.load %arg1[%c0, %c0_0] : memref<16x32xbf16, #tpu.memory_space<vmem>>, vector<16x32xbf16>
    %c0_1 = arith.constant 0 : index
    %c0_2 = arith.constant 0 : index
    %1 = vector.load %arg2[%c0_1, %c0_2] : memref<32x1024xbf16, #tpu.memory_space<vmem>>, vector<32x1024xbf16>
    %cst = arith.constant dense<0.000000e+00> : vector<16x1024xf32>
    %2 = tpu.matmul %0, %1, %cst {dimension_numbers = #tpu.dot_dimension_numbers<[1], [0], [0], [1], [0, 0, 1, 1], [], []>} : vector<16x32xbf16>, vector<32x1024xbf16>, vector<16x1024xf32> -> vector<16x1024xf32>
    %c0_3 = arith.constant 0 : index
    %c0_4 = arith.constant 0 : index
    %3 = vector.load %arg3[%c0_3, %c0_4] : memref<1x1024xf32, #tpu.memory_space<vmem>>, vector<1x1024xf32>
    %4 = vector.broadcast %3 : vector<1x1024xf32> to vector<16x1024xf32>
    %5 = arith.addf %2, %4 : vector<16x1024xf32>
    %6 = vector.extract_strided_slice %5 {offsets = [0, 0], sizes = [16, 128], strides = [1, 1]} : vector<16x1024xf32> to vector<16x128xf32>
    %7 = vector.extract_strided_slice %5 {offsets = [0, 128], sizes = [16, 128], strides = [1, 1]} : vector<16x1024xf32> to vector<16x128xf32>
    %8 = arith.maximumf %6, %7 : vector<16x128xf32>
    %9 = vector.extract_strided_slice %5 {offsets = [0, 256], sizes = [16, 128], strides = [1, 1]} : vector<16x1024xf32> to vector<16x128xf32>
    %10 = arith.maximumf %8, %9 : vector<16x128xf32>
    %11 = vector.extract_strided_slice %5 {offsets = [0, 384], sizes = [16, 128], strides = [1, 1]} : vector<16x1024xf32> to vector<16x128xf32>
    %12 = arith.maximumf %10, %11 : vector<16x128xf32>
    %13 = vector.extract_strided_slice %5 {offsets = [0, 512], sizes = [16, 128], strides = [1, 1]} : vector<16x1024xf32> to vector<16x128xf32>
    %14 = arith.maximumf %12, %13 : vector<16x128xf32>
    %15 = vector.extract_strided_slice %5 {offsets = [0, 640], sizes = [16, 128], strides = [1, 1]} : vector<16x1024xf32> to vector<16x128xf32>
    %16 = arith.maximumf %14, %15 : vector<16x128xf32>
    %17 = vector.extract_strided_slice %5 {offsets = [0, 768], sizes = [16, 128], strides = [1, 1]} : vector<16x1024xf32> to vector<16x128xf32>
    %18 = arith.maximumf %16, %17 : vector<16x128xf32>
    %19 = vector.extract_strided_slice %5 {offsets = [0, 896], sizes = [16, 128], strides = [1, 1]} : vector<16x1024xf32> to vector<16x128xf32>
    %20 = arith.maximumf %18, %19 : vector<16x128xf32>
    %cst_5 = arith.constant dense<0xFF800000> : vector<16xf32>
    %21 = vector.multi_reduction <maximumf>, %20, %cst_5 [1] : vector<16x128xf32> to vector<16xf32>
    %22 = vector.shape_cast %21 : vector<16xf32> to vector<16x1xf32>
    %cst_6 = arith.constant 0.000000e+00 : f32
    %23 = vector.broadcast %cst_6 : f32 to vector<16x128xf32>
    %24 = vector.extract_strided_slice %5 {offsets = [0, 0], sizes = [16, 128], strides = [1, 1]} : vector<16x1024xf32> to vector<16x128xf32>
    %25 = vector.broadcast %22 : vector<16x1xf32> to vector<16x128xf32>
    %26 = arith.subf %24, %25 : vector<16x128xf32>
    %27 = math.exp %26 : vector<16x128xf32>
    %28 = arith.addf %23, %27 : vector<16x128xf32>
    %29 = vector.extract_strided_slice %5 {offsets = [0, 128], sizes = [16, 128], strides = [1, 1]} : vector<16x1024xf32> to vector<16x128xf32>
    %30 = vector.broadcast %22 : vector<16x1xf32> to vector<16x128xf32>
    %31 = arith.subf %29, %30 : vector<16x128xf32>
    %32 = math.exp %31 : vector<16x128xf32>
    %33 = arith.addf %28, %32 : vector<16x128xf32>
    %34 = vector.extract_strided_slice %5 {offsets = [0, 256], sizes = [16, 128], strides = [1, 1]} : vector<16x1024xf32> to vector<16x128xf32>
    %35 = vector.broadcast %22 : vector<16x1xf32> to vector<16x128xf32>
    %36 = arith.subf %34, %35 : vector<16x128xf32>
    %37 = math.exp %36 : vector<16x128xf32>
    %38 = arith.addf %33, %37 : vector<16x128xf32>
    %39 = vector.extract_strided_slice %5 {offsets = [0, 384], sizes = [16, 128], strides = [1, 1]} : vector<16x1024xf32> to vector<16x128xf32>
    %40 = vector.broadcast %22 : vector<16x1xf32> to vector<16x128xf32>
    %41 = arith.subf %39, %40 : vector<16x128xf32>
    %42 = math.exp %41 : vector<16x128xf32>
    %43 = arith.addf %38, %42 : vector<16x128xf32>
    %44 = vector.extract_strided_slice %5 {offsets = [0, 512], sizes = [16, 128], strides = [1, 1]} : vector<16x1024xf32> to vector<16x128xf32>
    %45 = vector.broadcast %22 : vector<16x1xf32> to vector<16x128xf32>
    %46 = arith.subf %44, %45 : vector<16x128xf32>
    %47 = math.exp %46 : vector<16x128xf32>
    %48 = arith.addf %43, %47 : vector<16x128xf32>
    %49 = vector.extract_strided_slice %5 {offsets = [0, 640], sizes = [16, 128], strides = [1, 1]} : vector<16x1024xf32> to vector<16x128xf32>
    %50 = vector.broadcast %22 : vector<16x1xf32> to vector<16x128xf32>
    %51 = arith.subf %49, %50 : vector<16x128xf32>
    %52 = math.exp %51 : vector<16x128xf32>
    %53 = arith.addf %48, %52 : vector<16x128xf32>
    %54 = vector.extract_strided_slice %5 {offsets = [0, 768], sizes = [16, 128], strides = [1, 1]} : vector<16x1024xf32> to vector<16x128xf32>
    %55 = vector.broadcast %22 : vector<16x1xf32> to vector<16x128xf32>
    %56 = arith.subf %54, %55 : vector<16x128xf32>
    %57 = math.exp %56 : vector<16x128xf32>
    %58 = arith.addf %53, %57 : vector<16x128xf32>
    %59 = vector.extract_strided_slice %5 {offsets = [0, 896], sizes = [16, 128], strides = [1, 1]} : vector<16x1024xf32> to vector<16x128xf32>
    %60 = vector.broadcast %22 : vector<16x1xf32> to vector<16x128xf32>
    %61 = arith.subf %59, %60 : vector<16x128xf32>
    %62 = math.exp %61 : vector<16x128xf32>
    %63 = arith.addf %58, %62 : vector<16x128xf32>
    %cst_7 = arith.constant dense<0.000000e+00> : vector<16xf32>
    %64 = vector.multi_reduction <add>, %63, %cst_7 [1] : vector<16x128xf32> to vector<16xf32>
    %65 = vector.shape_cast %64 : vector<16xf32> to vector<16x1xf32>
    %66 = math.log %65 : vector<16x1xf32>
    %67 = arith.addf %22, %66 : vector<16x1xf32>
    %68 = vector.broadcast %67 : vector<16x1xf32> to vector<16x1024xf32>
    %69 = arith.subf %5, %68 : vector<16x1024xf32>
    %c0_8 = arith.constant 0 : index
    %c0_9 = arith.constant 0 : index
    %70 = vector.load %arg4[%c0_8, %c0_9] : memref<16x1024xf32, #tpu.memory_space<vmem>>, vector<16x1024xf32>
    tpu.vector_store %arg4[%c0_8, %c0_9], %69 {strides = array<i32>} : memref<16x1024xf32, #tpu.memory_space<vmem>>, vector<16x1024xf32>,
    return
  }
  func.func @transform_0(%arg0: i32) -> (i32, i32) {
    %c0_i32 = arith.constant 0 : i32
    %c0_i32_0 = arith.constant 0 : i32
    return %arg0, %c0_i32 : i32, i32
  }
  func.func @transform_1(%arg0: i32) -> (i32, i32) {
    %c0_i32 = arith.constant 0 : i32
    %c0_i32_0 = arith.constant 0 : i32
    %c0_i32_1 = arith.constant 0 : i32
    return %c0_i32, %c0_i32_0 : i32, i32
  }
  func.func @transform_2(%arg0: i32) -> (i32, i32) {
    %c0_i32 = arith.constant 0 : i32
    %c0_i32_0 = arith.constant 0 : i32
    %c0_i32_1 = arith.constant 0 : i32
    return %c0_i32, %c0_i32_0 : i32, i32
  }
  func.func @transform_3(%arg0: i32) -> (i32, i32) {
    %c0_i32 = arith.constant 0 : i32
    %c0_i32_0 = arith.constant 0 : i32
    return %arg0, %c0_i32 : i32, i32
  }
}

</mosaic_0001>

<bundles_post_ra>
// kernel: tpu_custom_call.1
= control target key start
LH: loop header
LB: loop body
LE: loop exit
PB: predicated region body
PF: predicated region fallthrough
CT: control target
= control target key end

     0   :  { %8 = vsyncpa [#allocation3], 0  ;;  %s867_s0 = inlined_call_operand.hbm [shape: bf16[16,32], index: 0, kind: input, shape index: {}]   ;;  %s868_s1 = inlined_call_operand.hbm [shape: bf16[32,1024], index: 1, kind: input, shape index: {}]   ;;  %s869_s2 = inlined_call_operand.hbm [shape: f32[1,1024], index: 2, kind: input, shape index: {}]   ;;  %s870_s3 = inlined_call_operand.hbm [shape: f32[16,1024], index: 3, kind: output, shape index: {}]  }
   0x1   :  { %9 = vsyncpa [#allocation6], 0 }
   0x2   :  { %10 = vsyncpa [#allocation4], 0  ;;  %s680_s12 = smov [#allocation5]   ;;  %s586_s16 = scalar_lea.hbm %s868_s1, 2048 }
   0x3   :  { %s28_s13 = sshll.u32 %s680_s12, 4  ;;  %p587_p0 = scmp.ne.s32.totalorder %s868_s1, %s586_s16  ;;  %s29_s13 = int_to_ptr.vmem [resolvable:$true] %s28_s13 }
   0x4   :  { %p590_p1 = scmp.lt.u32.totalorder %s586_s16, %s868_s1 }
   0x6   :  { %p592_p2 = pnand %p590_p1, %p587_p0 }
   0x8   :  { %595 = shalt.err (!%p592_p2)
}
   0x9   :  { %s596_s21 = scalar_lea.vmem %s29_s13, 2048  ;;  %p601_p4 = scmp.lt.s32.totalorder %s29_s13, %s29_s13 }
   0xa   :  { %p597_p3 = scmp.ne.s32.totalorder %s29_s13, %s596_s21  ;;  %p602_p5 = scmp.lt.s32.totalorder %s596_s21, %s596_s21 }
   0xc   :  { %p603_p6 = por %p602_p5, %p601_p4 }
   0xe   :  { %p604_p7 = pnand %p603_p6, %p597_p3 }
  0x10   :  { %607 = shalt.err (!%p604_p7)
}
  0x11   :  { %s681_s22 = smov 512   ;;  %s682_s23 = smov 32  }
  0x12   :  { %34 = dma.hbm_to_vmem [thread:$0]  %s868_s1, 2048, %s29_s13, [#allocation6], %s681_s22, %s681_s22, %s682_s23  }
  0x13   :  { %s683_s26 = smov [#allocation2]   ;;  %s608_s30 = scalar_lea.hbm %s867_s0, 128 }
  0x14   :  { %s16_s27 = sshll.u32 %s683_s26, 4  ;;  %p609_p8 = scmp.ne.s32.totalorder %s867_s0, %s608_s30  ;;  %s17_s27 = int_to_ptr.vmem [resolvable:$true] %s16_s27 }
  0x15   :  { %p612_p9 = scmp.lt.u32.totalorder %s608_s30, %s867_s0 }
  0x17   :  { %p614_p10 = pnand %p612_p9, %p609_p8 }
  0x19   :  { %617 = shalt.err (!%p614_p10)
}
  0x1a   :  { %s618_s8 = scalar_lea.vmem %s17_s27, 128  ;;  %p623_p12 = scmp.lt.s32.totalorder %s17_s27, %s17_s27 }
  0x1b   :  { %p619_p11 = scmp.ne.s32.totalorder %s17_s27, %s618_s8  ;;  %p624_p13 = scmp.lt.s32.totalorder %s618_s8, %s618_s8 }
  0x1d   :  { %p625_p0 = por %p624_p13, %p623_p12 }
  0x1f   :  { %p626_p1 = pnand %p625_p0, %p619_p11 }
  0x21   :  { %629 = shalt.err (!%p626_p1)
}
  0x22   :  { %s684_s1 = smov 64   ;;  %s685_s9 = smov 4  }
  0x23   :  { %22 = dma.hbm_to_vmem [thread:$0]  %s867_s0, 128, %s17_s27, [#allocation3], %s684_s1, %s684_s1, %s685_s9  }
  0x24   :  { %s686_s12 = smov [#allocation7]   ;;  %s630_s16 = scalar_lea.hbm %s869_s2, 128 }
  0x25   :  { %s41_s13 = sshll.u32 %s686_s12, 4  ;;  %p631_p2 = scmp.ne.s32.totalorder %s869_s2, %s630_s16  ;;  %s42_s13 = int_to_ptr.vmem [resolvable:$true] %s41_s13 }
  0x26   :  { %p634_p3 = scmp.lt.u32.totalorder %s630_s16, %s869_s2 }
  0x28   :  { %p636_p4 = pnand %p634_p3, %p631_p2 }
  0x2a   :  { %639 = shalt.err (!%p636_p4)
}
  0x2b   :  { %s640_s21 = scalar_lea.vmem %s42_s13, 128  ;;  %p645_p6 = scmp.lt.s32.totalorder %s42_s13, %s42_s13 }
  0x2c   :  { %p641_p5 = scmp.ne.s32.totalorder %s42_s13, %s640_s21  ;;  %p646_p7 = scmp.lt.s32.totalorder %s640_s21, %s640_s21 }
  0x2e   :  { %p647_p8 = por %p646_p7, %p645_p6 }
  0x30   :  { %p648_p9 = pnand %p647_p8, %p641_p5 }
  0x32   :  { %651 = shalt.err (!%p648_p9)
}
  0x33   :  { %44 = dma.hbm_to_vmem [thread:$0]  %s869_s2, 128, %s42_s13, [#allocation6]  }
  0x34   :  { %674 = dma.done.wait [#allocation3], 128  }
  0x35   :  { %675 = vsyncadd [#allocation3], 4294967168 }
  0x36   :  { %676 = dma.done.wait [#allocation6], 2176  }
  0x37   :  { %677 = vsyncadd [#allocation6], 4294965120  ;;  %v687_v0 = vmov 0   ;;  %v57_v1 = vld [vmem:[#allocation5] sm:$0xff]  ;;  %v58_v3 = vld [vmem:[#allocation5 + $0x8] sm:$0xff]  ;;  %vm200_vm0 = vcmask 261120   ;;  %v75_v34 = vlaneseq }
  0x38   :  { %236 = vmatprep.mubr.bf16.mxu0 %v687_v0  ;;  %279 = vmatprep.mubr.bf16.mxu1 %v687_v0  ;;  %v61_v2 = vld [vmem:[#allocation5 + $0x20] sm:$0xff]  ;;  %v62_v6 = vld [vmem:[#allocation5 + $0x28] sm:$0xff]  ;;  %v59_v15 = vld [vmem:[#allocation5 + $0x10] sm:$0xff]  ;;  %s688_s2 = smov [#allocation8]  }
  0x39   :  { %v520_v4 = vcombine.high %v57_v1, %v61_v2  ;;  %v519_v5 = vcombine.low %v57_v1, %v61_v2  ;;  %v65_v7 = vld [vmem:[#allocation5 + $0x40] sm:$0xff]  ;;  %v522_v9 = vcombine.high %v58_v3, %v62_v6  ;;  %v521_v10 = vcombine.low %v58_v3, %v62_v6  ;;  %v66_v12 = vld [vmem:[#allocation5 + $0x48] sm:$0xff]  ;;  %v63_v17 = vld [vmem:[#allocation5 + $0x30] sm:$0xff]  ;;  %s505_s23 = sshll.u32 %s688_s2, 4  ;;  %s506_s23 = int_to_ptr.vmem [resolvable:$true] %s505_s23 }
  0x3a   :  { %v69_v8 = vld [vmem:[#allocation5 + $0x60] sm:$0xff]  ;;  %v70_v13 = vld [vmem:[#allocation5 + $0x68] sm:$0xff]  ;;  %v60_v18 = vld [vmem:[#allocation5 + $0x18] sm:$0xff]  ;;  %v524_v21 = vcombine.high %v59_v15, %v63_v17  ;;  %v523_v28 = vcombine.low %v59_v15, %v63_v17  ;;  %v76_v35 = vshrl.u32 %v75_v34, 7  ;;  %s652_s24 = scalar_lea.vmem %s506_s23, 2048  ;;  %p657_p11 = scmp.lt.s32.totalorder %s506_s23, %s506_s23 }
  0x3b   :  { %v528_v11 = vcombine.high %v65_v7, %v69_v8  ;;  %204 = vmatprep.subr.bf16.mxu0 %v520_v4  ;;  %v530_v14 = vcombine.high %v66_v12, %v70_v13  ;;  %247 = vmatprep.subr.bf16.mxu1 %v522_v9  ;;  %v527_v16 = vcombine.low %v65_v7, %v69_v8  ;;  %v64_v19 = vld [vmem:[#allocation5 + $0x38] sm:$0xff]  ;;  %v67_v23 = vld [vmem:[#allocation5 + $0x50] sm:$0xff]  ;;  %v73_v37 = vld [vmem:[#allocation7] sm:$0xff]  ;;  %p653_p10 = scmp.ne.s32.totalorder %s506_s23, %s652_s24  ;;  %p658_p12 = scmp.lt.s32.totalorder %s652_s24, %s652_s24 }
  0x3c   :  { %205 = vmatpush1.bf16.msra.mxu0 %v519_v5  ;;  %248 = vmatpush1.bf16.msra.mxu1 %v521_v10  ;;  %v529_v20 = vcombine.low %v66_v12, %v70_v13  ;;  %v526_v22 = vcombine.high %v60_v18, %v64_v19  ;;  %v71_v24 = vld [vmem:[#allocation5 + $0x70] sm:$0xff]  ;;  %v549_v25 = vld [vmem:[#allocation2] sm:$0xff]   ;;  %v525_v29 = vcombine.low %v60_v18, %v64_v19  ;;  %v77_v36 = vsub.s32 0, %v76_v35 }
  0x3d   :  { %206 = vmatprep.subr.bf16.mxu0 %v528_v11  ;;  %249 = vmatprep.subr.bf16.mxu1 %v530_v14  ;;  %v68_v26 = vld [vmem:[#allocation5 + $0x58] sm:$0xff]  ;;  %v532_v30 = vcombine.high %v67_v23, %v71_v24  ;;  %v531_v32 = vcombine.low %v67_v23, %v71_v24  ;;  %v81_v38 = vsub.s32 1, %v76_v35  ;;  %v85_v39 = vsub.s32 2, %v76_v35  ;;  %p659_p13 = por %p658_p12, %p657_p11 }
  0x3e   :  { %v72_v27 = vld [vmem:[#allocation5 + $0x78] sm:$0xff]  ;;  %v89_v40 = vsub.s32 3, %v76_v35  ;;  %v78_v41 = vrot.slane %v73_v37, %v77_v36  ;;  %v93_v49 = vsub.s32 4, %v76_v35  ;;  %v97_v54 = vsub.s32 5, %v76_v35 }
  0x3f   :  { %v534_v31 = vcombine.high %v68_v26, %v72_v27  ;;  %v533_v33 = vcombine.low %v68_v26, %v72_v27  ;;  %v82_v42 = vrot.slane %v73_v37, %v81_v38  ;;  %v86_v43 = vrot.slane %v73_v37, %v85_v39  ;;  %p660_p0 = pnand %p659_p13, %p653_p10 }
  0x40   :  { %207 = vmatpush1.bf16.msra.mxu0 %v527_v16  ;;  %250 = vmatpush1.bf16.msra.mxu1 %v529_v20  ;;  %v90_v45 = vrot.slane %v73_v37, %v89_v40  ;;  %v101_v58 = vsub.s32 6, %v76_v35  ;;  %v98_v3 = vrot.slane %v73_v37, %v97_v54  ;;  %v105_v5 = vsub.s32 7, %v76_v35 }
  0x41   :  { %290 = vmatprep.subr.bf16.mxu0 %v524_v21  ;;  %333 = vmatprep.subr.bf16.mxu1 %v526_v22 }
  0x42   :  { %v102_v4 = vrot.slane %v73_v37, %v101_v58  ;;  %v106_v21 = vrot.slane %v73_v37, %v105_v5 }
  0x43   :  { %535 = vmatmul.mubr.msk.bf16.vlgmr.msra.gmra.mrb[0].mxu0 %vm200_vm0, %v549_v25  ;;  %536 = vmatmul.mubr.msk.bf16.vlgmr.msra.gmra.mrb[0].mxu1 %vm200_vm0, %v549_v25 }
  0x44   :  { %291 = vmatpush1.bf16.msra.mxu0 %v523_v28  ;;  %334 = vmatpush1.bf16.msra.mxu1 %v525_v29 }
  0x45   :  { %292 = vmatprep.subr.bf16.mxu0 %v532_v30  ;;  %335 = vmatprep.subr.bf16.mxu1 %v534_v31 }
  0x46   :  { %322 = vmatprep.mubr.bf16.mxu0 %v687_v0  ;;  %365 = vmatprep.mubr.bf16.mxu1 %v687_v0  ;;  %v94_v0 = vrot.slane %v73_v37, %v93_v49 }
  0x48   :  { %293 = vmatpush1.bf16.msra.mxu0 %v531_v32  ;;  %336 = vmatpush1.bf16.msra.mxu1 %v533_v33 }
  0x4b   :  { %537 = vmatmul.mubr.msk.bf16.vlgmr.msra.gmra.mrb[4].mxu0 %vm200_vm0, %v549_v25  ;;  %538 = vmatmul.mubr.msk.bf16.vlgmr.msra.gmra.mrb[4].mxu1 %vm200_vm0, %v549_v25 }
 0x116   :  { %v238_v44 = vpop.f32.mrb[0].mxu0  ;;  %v281_v48 = vpop.f32.mrb[0].mxu1 }
 0x117   :  { %v752_v46 = vadd.f32 %v238_v44, %v78_v41  ;;  %v240_v47 = vpop.f32.mrb[1].mxu0  ;;  %v756_v52 = vadd.f32 %v281_v48, %v86_v43  ;;  %v283_v53 = vpop.f32.mrb[1].mxu1 }
 0x118   :  { %v754_v50 = vadd.f32 %v240_v47, %v82_v42  ;;  %v242_v51 = vpop.f32.mrb[2].mxu0  ;;  %v285_v57 = vpop.f32.mrb[2].mxu1  ;;  %v764_v61 = vadd.f32 %v283_v53, %v90_v45 }
 0x119   :  { %v758_v55 = vadd.f32 %v242_v51, %v78_v41  ;;  %v244_v56 = vpop.f32.mrb[3].mxu0  ;;  %v766_v62 = vadd.f32 %v285_v57, %v86_v43  ;;  %v287_v63 = vpop.f32.mrb[3].mxu1 }
 0x11a   :  { %v376_v59 = vmax.f32 %v752_v46, %v754_v50  ;;  %v762_v60 = vadd.f32 %v244_v56, %v82_v42  ;;  %v773_v8 = vadd.f32 %v287_v63, %v90_v45 }
 0x11c   :  { %v378_v1 = vmax.f32 %v376_v59, %v756_v52  ;;  %v377_v2 = vmax.f32 %v758_v55, %v762_v60 }
 0x11e   :  { %v380_v6 = vmax.f32 %v378_v1, %v764_v61  ;;  %v379_v7 = vmax.f32 %v377_v2, %v766_v62  ;;  %v324_v9 = vpop.f32.mrb[4].mxu0  ;;  %v367_v12 = vpop.f32.mrb[4].mxu1 }
 0x11f   :  { %v775_v10 = vadd.f32 %v324_v9, %v94_v0  ;;  %v326_v11 = vpop.f32.mrb[5].mxu0  ;;  %v369_v16 = vpop.f32.mrb[5].mxu1  ;;  %v783_v19 = vadd.f32 %v367_v12, %v102_v4 }
 0x120   :  { %v381_v13 = vmax.f32 %v379_v7, %v773_v8  ;;  %v778_v14 = vadd.f32 %v326_v11, %v98_v3  ;;  %v328_v15 = vpop.f32.mrb[6].mxu0  ;;  %v371_v22 = vpop.f32.mrb[6].mxu1  ;;  %v790_v28 = vadd.f32 %v369_v16, %v106_v21 }
 0x121   :  { %v382_v17 = vmax.f32 %v380_v6, %v775_v10  ;;  %v781_v18 = vadd.f32 %v328_v15, %v94_v0  ;;  %v330_v20 = vpop.f32.mrb[7].mxu0  ;;  %v373_v24 = vpop.f32.mrb[7].mxu1  ;;  %v792_v29 = vadd.f32 %v371_v22, %v102_v4 }
 0x122   :  { %v785_v23 = vadd.f32 %v330_v20, %v98_v3  ;;  %v797_v33 = vadd.f32 %v373_v24, %v106_v21 }
 0x123   :  { %v383_v25 = vmax.f32 %v381_v13, %v781_v18  ;;  %v384_v26 = vmax.f32 %v382_v17, %v778_v14 }
 0x125   :  { %v385_v27 = vmax.f32 %v383_v25, %v785_v23  ;;  %v386_v30 = vmax.f32 %v384_v26, %v783_v19 }
 0x127   :  { %v388_v31 = vmax.f32 %v386_v30, %v790_v28  ;;  %v387_v32 = vmax.f32 %v385_v27, %v792_v29 }
 0x129   :  { %390 = vmax.xlane.f32.xlu0 %v388_v31  ;;  %v389_v34 = vmax.f32 %v387_v32, %v797_v33 }
 0x12d   :  { %392 = vmax.xlane.f32.xlu0 %v389_v34 }
 0x1b6   :  { %v800_v35 = vpop.xlane.xlu0 %390 }
 0x1b7   :  { %v394_v36 = vsub.f32 %v752_v46, %v800_v35  ;;  %v402_v37 = vsub.f32 %v754_v50, %v800_v35  ;;  %v410_v38 = vsub.f32 %v756_v52, %v800_v35  ;;  %v418_v43 = vsub.f32 %v764_v61, %v800_v35 }
 0x1b8   :  { %v426_v48 = vsub.f32 %v775_v10, %v800_v35  ;;  %v434_v54 = vsub.f32 %v778_v14, %v800_v35  ;;  %v442_v59 = vsub.f32 %v783_v19, %v800_v35  ;;  %v450_v1 = vsub.f32 %v790_v28, %v800_v35 }
 0x1b9   :  { %v396_v39 = vmul.f32 1.442695, %v394_v36  ;;  %v404_v40 = vmul.f32 1.442695, %v402_v37  ;;  %v412_v42 = vmul.f32 1.442695, %v410_v38 }
 0x1ba   :  { %v808_v41 = vpop.xlane.xlu0 %392  ;;  %v420_v53 = vmul.f32 1.442695, %v418_v43  ;;  %v428_v58 = vmul.f32 1.442695, %v426_v48  ;;  %v436_v0 = vmul.f32 1.442695, %v434_v54 }
 0x1bb   :  { %v395_v44 = vsub.f32 %v758_v55, %v808_v41  ;;  %v403_v45 = vsub.f32 %v762_v60, %v808_v41  ;;  %v411_v47 = vsub.f32 %v766_v62, %v808_v41  ;;  %550 = vpow2.f32 %v396_v39 }
 0x1bc   :  { %552 = vpow2.f32 %v404_v40  ;;  %v419_v57 = vsub.f32 %v773_v8, %v808_v41  ;;  %v427_v63 = vsub.f32 %v781_v18, %v808_v41  ;;  %v435_v3 = vsub.f32 %v785_v23, %v808_v41 }
 0x1bd   :  { %v398_v49 = vmul.f32 1.442695, %v395_v44  ;;  %v406_v51 = vmul.f32 1.442695, %v403_v45  ;;  %554 = vpow2.f32 %v412_v42  ;;  %v414_v56 = vmul.f32 1.442695, %v411_v47 }
 0x1be   :  { %v422_v2 = vmul.f32 1.442695, %v419_v57  ;;  %v444_v4 = vmul.f32 1.442695, %v442_v59  ;;  %v430_v5 = vmul.f32 1.442695, %v427_v63  ;;  %v443_v6 = vsub.f32 %v792_v29, %v808_v41 }
 0x1bf   :  { %556 = vpow2.f32 %v398_v49  ;;  %v452_v9 = vmul.f32 1.442695, %v450_v1  ;;  %v438_v12 = vmul.f32 1.442695, %v435_v3  ;;  %v451_v13 = vsub.f32 %v797_v33, %v808_v41 }
 0x1c0   :  { %558 = vpow2.f32 %v406_v51  ;;  %v446_v20 = vmul.f32 1.442695, %v443_v6 }
 0x1c1   :  { %560 = vpow2.f32 %v420_v53  ;;  %v454_v25 = vmul.f32 1.442695, %v451_v13 }
 0x1c2   :  { %562 = vpow2.f32 %v414_v56 }
 0x1c3   :  { %564 = vpow2.f32 %v428_v58 }
 0x1c4   :  { %566 = vpow2.f32 %v436_v0 }
 0x1c5   :  { %v551_v7 = vpop.eup %550  ;;  %568 = vpow2.f32 %v422_v2 }
 0x1c6   :  { %v553_v11 = vpop.eup %552  ;;  %570 = vpow2.f32 %v444_v4 }
 0x1c7   :  { %v555_v15 = vpop.eup %554  ;;  %v408_v16 = vadd.f32 %v553_v11, %v551_v7  ;;  %572 = vpow2.f32 %v430_v5 }
 0x1c8   :  { %574 = vpow2.f32 %v452_v9 }
 0x1c9   :  { %v557_v17 = vpop.eup %556  ;;  %v416_v22 = vadd.f32 %v555_v15, %v408_v16  ;;  %576 = vpow2.f32 %v438_v12 }
 0x1ca   :  { %v559_v21 = vpop.eup %558  ;;  %578 = vpow2.f32 %v446_v20 }
 0x1cb   :  { %v409_v24 = vadd.f32 %v559_v21, %v557_v17  ;;  %v561_v26 = vpop.eup %560  ;;  %580 = vpow2.f32 %v454_v25 }
 0x1cc   :  { %v563_v27 = vpop.eup %562  ;;  %v424_v30 = vadd.f32 %v561_v26, %v416_v22 }
 0x1cd   :  { %v565_v31 = vpop.eup %564  ;;  %v417_v32 = vadd.f32 %v563_v27, %v409_v24 }
 0x1ce   :  { %v432_v34 = vadd.f32 %v565_v31, %v424_v30  ;;  %v567_v36 = vpop.eup %566 }
 0x1cf   :  { %v569_v37 = vpop.eup %568 }
 0x1d0   :  { %v440_v38 = vadd.f32 %v567_v36, %v432_v34  ;;  %v571_v39 = vpop.eup %570  ;;  %v425_v40 = vadd.f32 %v569_v37, %v417_v32 }
 0x1d1   :  { %v573_v42 = vpop.eup %572 }
 0x1d2   :  { %v448_v43 = vadd.f32 %v571_v39, %v440_v38  ;;  %v575_v44 = vpop.eup %574  ;;  %v433_v45 = vadd.f32 %v573_v42, %v425_v40 }
 0x1d3   :  { %v577_v47 = vpop.eup %576 }
 0x1d4   :  { %v456_v48 = vadd.f32 %v575_v44, %v448_v43  ;;  %v441_v49 = vadd.f32 %v577_v47, %v433_v45  ;;  %v579_v51 = vpop.eup %578 }
 0x1d5   :  { %v581_v54 = vpop.eup %580 }
 0x1d6   :  { %458 = vadd.xlane.f32.xlu1 %v456_v48  ;;  %v449_v53 = vadd.f32 %v579_v51, %v441_v49 }
 0x1d8   :  { %v457_v56 = vadd.f32 %v581_v54, %v449_v53 }
 0x1da   :  { %460 = vadd.xlane.f32.xlu1 %v457_v56 }
 0x263   :  { %v459_v57 = vpop.xlane.xlu1 %458 }
 0x264   :  { %582 = vlog2.f32 %v459_v57 }
 0x267   :  { %v461_v58 = vpop.xlane.xlu1 %460 }
 0x268   :  { %584 = vlog2.f32 %v461_v58 }
 0x26e   :  { %v583_v59 = vpop.eup %582 }
 0x26f   :  { %v463_v63 = vmul.f32 0.6931472, %v583_v59 }
 0x271   :  { %v466_v0 = vadd.f32 %v463_v63, %v800_v35 }
 0x272   :  { %v585_v1 = vpop.eup %584 }
 0x273   :  { %v468_v2 = vsub.f32 %v752_v46, %v466_v0  ;;  %v469_v3 = vsub.f32 %v754_v50, %v466_v0  ;;  %v470_v4 = vsub.f32 %v756_v52, %v466_v0  ;;  %v471_v5 = vsub.f32 %v764_v61, %v466_v0 }
 0x274   :  { %v472_v6 = vsub.f32 %v775_v10, %v466_v0  ;;  %v473_v7 = vsub.f32 %v778_v14, %v466_v0  ;;  %v474_v9 = vsub.f32 %v783_v19, %v466_v0  ;;  %v475_v11 = vsub.f32 %v790_v28, %v466_v0 }
 0x275   :  { %484 = vst [vmem:[#allocation8] sm:$0xff] %v468_v2  ;;  %485 = vst [vmem:[#allocation8 + $0x8] sm:$0xff] %v469_v3  ;;  %v465_v35 = vmul.f32 0.6931472, %v585_v1 }
 0x276   :  { %486 = vst [vmem:[#allocation8 + $0x10] sm:$0xff] %v470_v4  ;;  %487 = vst [vmem:[#allocation8 + $0x18] sm:$0xff] %v471_v5 }
 0x277   :  { %488 = vst [vmem:[#allocation8 + $0x20] sm:$0xff] %v472_v6  ;;  %489 = vst [vmem:[#allocation8 + $0x28] sm:$0xff] %v473_v7  ;;  %v467_v46 = vadd.f32 %v465_v35, %v808_v41 }
 0x278   :  { %490 = vst [vmem:[#allocation8 + $0x30] sm:$0xff] %v474_v9  ;;  %491 = vst [vmem:[#allocation8 + $0x38] sm:$0xff] %v475_v11 }
 0x279   :  { %v476_v50 = vsub.f32 %v758_v55, %v467_v46  ;;  %v477_v52 = vsub.f32 %v762_v60, %v467_v46  ;;  %v478_v61 = vsub.f32 %v766_v62, %v467_v46  ;;  %v479_v10 = vsub.f32 %v773_v8, %v467_v46 }
 0x27a   :  { %v480_v14 = vsub.f32 %v781_v18, %v467_v46  ;;  %v481_v19 = vsub.f32 %v785_v23, %v467_v46  ;;  %v482_v28 = vsub.f32 %v792_v29, %v467_v46  ;;  %v483_v12 = vsub.f32 %v797_v33, %v467_v46 }
 0x27b   :  { %492 = vst [vmem:[#allocation8 + $0x40] sm:$0xff] %v476_v50  ;;  %493 = vst [vmem:[#allocation8 + $0x48] sm:$0xff] %v477_v52 }
 0x27c   :  { %494 = vst [vmem:[#allocation8 + $0x50] sm:$0xff] %v478_v61  ;;  %495 = vst [vmem:[#allocation8 + $0x58] sm:$0xff] %v479_v10 }
 0x27d   :  { %496 = vst [vmem:[#allocation8 + $0x60] sm:$0xff] %v480_v14  ;;  %497 = vst [vmem:[#allocation8 + $0x68] sm:$0xff] %v481_v19 }
 0x27e   :  { %498 = vst [vmem:[#allocation8 + $0x70] sm:$0xff] %v482_v28  ;;  %499 = vst [vmem:[#allocation8 + $0x78] sm:$0xff] %v483_v12 }
 0x27f   :  { %663 = shalt.err (!%p660_p0)
}
 0x280   :  { %s664_s27 = scalar_lea.hbm %s870_s3, 2048 }
 0x281   :  { %p665_p1 = scmp.ne.s32.totalorder %s870_s3, %s664_s27  ;;  %p668_p2 = scmp.lt.u32.totalorder %s664_s27, %s870_s3 }
 0x283   :  { %p670_p3 = pnand %p668_p2, %p665_p1 }
 0x285   :  { %673 = shalt.err (!%p670_p3)
}
 0x286   :  { %s689_s5 = smov 1024  }
 0x287   :  { %511 = dma.vmem_to_hbm [thread:$0]  %s506_s23, 2048, %s870_s3, [#allocation4], %s689_s5, %s689_s5, %s684_s1  }
 0x288   :  { %678 = dma.done.wait [#allocation4], 2048  }
 0x289   :  { %679 = vsyncadd [#allocation4], 4294965248 }
 0x28a   :  { %515 = vsyncpa [#allocation3], 1 }
 0x28b   :  { %516 = vsyncpa [#allocation6], 1 }
 0x28c   :  { %517 = vsyncpa [#allocation4], 1 }

</bundles_post_ra>
